<compile_context>
chip_gen: v6e
topology: v6e:2x2x1
jax: 0.10.0
libtpu: 0.0.40
codegen_flags: <defaults>
</compile_context>

<pallas_src>
import jax
import jax.numpy as jnp
from jax.experimental import pallas as pl
from jax.experimental.pallas import tpu as pltpu

_SUBLANE = 8


def _round_up(x, m):
    return ((x + m - 1) // m) * m


def _cdiv(a, b):
    return (a + b - 1) // b


# --------------------------------------------------------------------------
# Pallas kernel: fused MLP forward
#   h1     = relu(x @ W1 + b1)
#   h2     = relu(h1 @ W2 + b2)
#   logits = h2 @ Wp + bp        (exact-width store)
#   value  = h2 @ Wv + bv        (exact-width store)
# --------------------------------------------------------------------------
def _ppo_mlp_kernel(x_ref, w1_ref, b1_ref, w2_ref, b2_ref,
                    wp_ref, bp_ref, wv_ref, bv_ref,
                    logits_ref, value_ref):
    # MXU operands may already be bf16 (cast host-side); bias-add, ReLU and
    # accumulation stay f32 (v5e's VPU has no bf16 path).
    x = x_ref[...]

    h1 = jnp.dot(x, w1_ref[...], preferred_element_type=jnp.float32)
    h1 = jnp.maximum(h1 + b1_ref[...], 0.0)

    h2 = jnp.dot(h1.astype(w2_ref.dtype), w2_ref[...],
                 preferred_element_type=jnp.float32)
    h2 = jnp.maximum(h2 + b2_ref[...], 0.0)
    h2 = h2.astype(wp_ref.dtype)

    logits_ref[...] = (jnp.dot(h2, wp_ref[...],
                               preferred_element_type=jnp.float32)
                       + bp_ref[...]).astype(logits_ref.dtype)
    value_ref[...] = (jnp.dot(h2, wv_ref[...],
                              preferred_element_type=jnp.float32)
                      + bv_ref[...]).astype(value_ref.dtype)


def ppo_model_forward(x, params, *, batch_tile=2048,
                      compute_dtype=jnp.float32):
    """Fused PPO MLP forward pass as one Pallas call.

    Args:
      x: [B, obs_dim] float32 observations.
      params: dict with w1,b1,w2,b2,wp,bp,wv,bv (biases are 2-D: [1, out]).
      batch_tile: rows per grid step (rounded to a multiple of 8, capped at
        ceil(B/2) so v7x megacore gets >=2 grid steps).
      compute_dtype: dtype of the MXU operands (f32 or bf16). Inputs/weights
        are cast HOST-side so HBM traffic actually shrinks; accumulation,
        bias-add and ReLU are always f32.

    Returns:
      (logits [B, num_outputs], value [B, 1]) -- matches
      (self.policy_head(features), self.value_head(features)) in PyTorch.
    """
    B, obs_dim = x.shape
    h1_dim = params["w1"].shape[1]
    h2_dim = params["w2"].shape[1]
    num_outputs = params["wp"].shape[1]

    # Host-side casts (in-kernel casts would still DMA f32 and save nothing).
    x_in = x.astype(compute_dtype)
    w1 = params["w1"].astype(compute_dtype)
    w2 = params["w2"].astype(compute_dtype)
    wp = params["wp"].astype(compute_dtype)
    wv = params["wv"].astype(compute_dtype)
    b1, b2, bp, bv = params["b1"], params["b2"], params["bp"], params["bv"]

    # Batch tiling: big tile to amortize ~0.35us/step overhead, but >=2 grid
    # steps whenever B allows it (v7x megacore sharding of the batch axis).
    tb_cap = max(_SUBLANE, _round_up(_cdiv(B, 2), _SUBLANE))
    tb = max(_SUBLANE, min(_round_up(int(batch_tile), _SUBLANE), tb_cap))
    grid = (_cdiv(B, tb),)           # ragged last block handled by Pallas

    flops = 2 * B * (obs_dim * h1_dim + h1_dim * h2_dim
                     + h2_dim * (num_outputs + 1))
    bytes_accessed = int(x_in.nbytes + w1.nbytes + b1.nbytes + w2.nbytes
                         + b2.nbytes + wp.nbytes + bp.nbytes + wv.nbytes
                         + bv.nbytes + 4 * B * (num_outputs + 1))

    logits, value = pl.pallas_call(
        _ppo_mlp_kernel,
        out_shape=(jax.ShapeDtypeStruct((B, num_outputs), jnp.float32),
                   jax.ShapeDtypeStruct((B, 1), jnp.float32)),
        grid=grid,
        in_specs=[
            pl.BlockSpec((tb, obs_dim), lambda i: (i, 0)),        # x tile
            pl.BlockSpec((obs_dim, h1_dim), lambda i: (0, 0)),    # W1 resident
            pl.BlockSpec((1, h1_dim), lambda i: (0, 0)),          # b1 resident
            pl.BlockSpec((h1_dim, h2_dim), lambda i: (0, 0)),     # W2 resident
            pl.BlockSpec((1, h2_dim), lambda i: (0, 0)),          # b2 resident
            pl.BlockSpec((h2_dim, num_outputs), lambda i: (0, 0)),  # Wp
            pl.BlockSpec((1, num_outputs), lambda i: (0, 0)),       # bp
            pl.BlockSpec((h2_dim, 1), lambda i: (0, 0)),            # Wv
            pl.BlockSpec((1, 1), lambda i: (0, 0)),                 # bv
        ],
        out_specs=(pl.BlockSpec((tb, num_outputs), lambda i: (i, 0)),
                   pl.BlockSpec((tb, 1), lambda i: (i, 0))),
        compiler_params=pltpu.CompilerParams(
            dimension_semantics=("parallel",)),    # v7x: shard batch over TCs
        cost_estimate=pl.CostEstimate(flops=flops, transcendentals=0,
                                      bytes_accessed=bytes_accessed),
    )(x_in, w1, b1, w2, b2, wp, bp, wv, bv)

    return logits, value


def value_function(value_out):
    """Equivalent of CustomPPOModel.value_function(): squeeze last dim."""
    return jnp.squeeze(value_out, axis=1)


# --------------------------------------------------------------------------
# Deterministic parameter initialization (PyTorch nn.Linear-style uniform)
# --------------------------------------------------------------------------
def init_params(key, obs_dim, hidden_sizes, num_outputs):
    params = {}
    sizes = [obs_dim] + list(hidden_sizes)

    def linear(key, fan_in, fan_out):
        kw, kb = jax.random.split(key)
        bound = 1.0 / jnp.sqrt(float(fan_in))
        w = jax.random.uniform(kw, (fan_in, fan_out), jnp.float32,
                               minval=-bound, maxval=bound)
        b = jax.random.uniform(kb, (1, fan_out), jnp.float32,
                               minval=-bound, maxval=bound)
        return w, b

    keys = jax.random.split(key, len(hidden_sizes) + 2)
    params["w1"], params["b1"] = linear(keys[0], sizes[0], sizes[1])
    params["w2"], params["b2"] = linear(keys[1], sizes[1], sizes[2])
    params["wp"], params["bp"] = linear(keys[2], sizes[-1], num_outputs)
    params["wv"], params["bv"] = linear(keys[3], sizes[-1], 1)
    return params


# --------------------------------------------------------------------------
# Pure-JAX reference for correctness check
# --------------------------------------------------------------------------
def reference_forward(x, p):
    h1 = jnp.maximum(x @ p["w1"] + p["b1"], 0.0)
    h2 = jnp.maximum(h1 @ p["w2"] + p["b2"], 0.0)
    return h2 @ p["wp"] + p["bp"], h2 @ p["wv"] + p["bv"]


if __name__ == "__main__":
    # Small shapes consistent with the module: obs_dim=16, hidden=[32,32],
    # num_outputs=4 (discrete actions).
    OBS_DIM, NUM_OUTPUTS = 16, 4
    HIDDEN = [32, 32]

    key = jax.random.PRNGKey(0)
    k_obs, k_param, k_big = jax.random.split(key, 3)
    params = init_params(k_param, OBS_DIM, HIDDEN, NUM_OUTPUTS)

    # --- test 1: tiny batch (single grid step), f32 -------------------------
    B = 8
    x = jax.random.normal(k_obs, (B, OBS_DIM), dtype=jnp.float32)
    logits, value = ppo_model_forward(x, params)
    logits = jax.block_until_ready(logits)
    value = jax.block_until_ready(value)

    ref_logits, ref_value = reference_forward(x, params)
    assert logits.shape == (B, NUM_OUTPUTS)
    assert value.shape == (B, 1)
    assert jnp.allclose(logits, ref_logits, atol=1e-5, rtol=1e-5)
    assert jnp.allclose(value, ref_value, atol=1e-5, rtol=1e-5)

    v = jax.block_until_ready(value_function(value))
    assert v.shape == (B,)

    # --- test 2: non-tile-aligned batch, multi-step "parallel" grid ---------
    B2 = 300
    x2 = jax.random.normal(k_big, (B2, OBS_DIM), dtype=jnp.float32)
    logits2, value2 = ppo_model_forward(x2, params, batch_tile=128)
    logits2 = jax.block_until_ready(logits2)
    value2 = jax.block_until_ready(value2)
    ref_logits2, ref_value2 = reference_forward(x2, params)
    assert logits2.shape == (B2, NUM_OUTPUTS)
    assert value2.shape == (B2, 1)
    assert jnp.allclose(logits2, ref_logits2, atol=1e-5, rtol=1e-5)
    assert jnp.allclose(value2, ref_value2, atol=1e-5, rtol=1e-5)

    # --- test 3: bf16 MXU operands (host-side cast), loose check ------------
    logits_bf, value_bf = ppo_model_forward(x, params,
                                            compute_dtype=jnp.bfloat16)
    logits_bf = jax.block_until_ready(logits_bf)
    value_bf = jax.block_until_ready(value_bf)
    assert jnp.allclose(logits_bf, ref_logits, atol=1e-1, rtol=1e-1)
    assert jnp.allclose(value_bf, ref_value, atol=1e-1, rtol=1e-1)

    print("KERNEL_OK")
</pallas_src>

<mosaic_0001>
module attributes {stable_mosaic.version = 11 : i64} {
  func.func @_ppo_mlp_kernel(%arg0: i32, %arg1: memref<8x16xf32, #tpu.memory_space<vmem>>, %arg2: memref<16x32xf32, #tpu.memory_space<vmem>>, %arg3: memref<1x32xf32, #tpu.memory_space<vmem>>, %arg4: memref<32x32xf32, #tpu.memory_space<vmem>>, %arg5: memref<1x32xf32, #tpu.memory_space<vmem>>, %arg6: memref<32x4xf32, #tpu.memory_space<vmem>>, %arg7: memref<1x4xf32, #tpu.memory_space<vmem>>, %arg8: memref<32x1xf32, #tpu.memory_space<vmem>>, %arg9: memref<1x1xf32, #tpu.memory_space<vmem>>, %arg10: memref<8x4xf32, #tpu.memory_space<vmem>>, %arg11: memref<8x1xf32, #tpu.memory_space<vmem>>) attributes {dimension_semantics = [#tpu.dimension_semantics<parallel>], iteration_bounds = array<i64: 1>, scalar_prefetch = 0 : i64, scratch_operands = 0 : i64, tpu.core_type = #tpu.core_type<tc>, window_params = [{transform_indices = @transform_0, window_bounds = array<i64: 8, 16>}, {pipeline_mode = #tpu.pipeline_mode<synchronous>, transform_indices = @transform_1, window_bounds = array<i64: 16, 32>}, {pipeline_mode = #tpu.pipeline_mode<synchronous>, transform_indices = @transform_2, window_bounds = array<i64: 1, 32>}, {pipeline_mode = #tpu.pipeline_mode<synchronous>, transform_indices = @transform_3, window_bounds = array<i64: 32, 32>}, {pipeline_mode = #tpu.pipeline_mode<synchronous>, transform_indices = @transform_4, window_bounds = array<i64: 1, 32>}, {pipeline_mode = #tpu.pipeline_mode<synchronous>, transform_indices = @transform_5, window_bounds = array<i64: 32, 4>}, {pipeline_mode = #tpu.pipeline_mode<synchronous>, transform_indices = @transform_6, window_bounds = array<i64: 1, 4>}, {pipeline_mode = #tpu.pipeline_mode<synchronous>, transform_indices = @transform_7, window_bounds = array<i64: 32, 1>}, {pipeline_mode = #tpu.pipeline_mode<synchronous>, transform_indices = @transform_8, window_bounds = array<i64: 1, 1>}, {transform_indices = @transform_9, window_bounds = array<i64: 8, 4>}, {transform_indices = @transform_10, window_bounds = array<i64: 8, 1>}]} {
    %c0 = arith.constant 0 : index
    %c0_0 = arith.constant 0 : index
    %0 = vector.load %arg1[%c0, %c0_0] : memref<8x16xf32, #tpu.memory_space<vmem>>, vector<8x16xf32>
    %c0_1 = arith.constant 0 : index
    %c0_2 = arith.constant 0 : index
    %1 = vector.load %arg2[%c0_1, %c0_2] : memref<16x32xf32, #tpu.memory_space<vmem>>, vector<16x32xf32>
    %cst = arith.constant dense<0.000000e+00> : vector<8x32xf32>
    %2 = tpu.matmul %0, %1, %cst {dimension_numbers = #tpu.dot_dimension_numbers<[1], [0], [0], [1], [0, 0, 1, 1], [], []>} : vector<8x16xf32>, vector<16x32xf32>, vector<8x32xf32> -> vector<8x32xf32>
    %c0_3 = arith.constant 0 : index
    %c0_4 = arith.constant 0 : index
    %3 = vector.load %arg3[%c0_3, %c0_4] : memref<1x32xf32, #tpu.memory_space<vmem>>, vector<1x32xf32>
    %4 = vector.broadcast %3 : vector<1x32xf32> to vector<8x32xf32>
    %5 = arith.addf %2, %4 : vector<8x32xf32>
    %cst_5 = arith.constant 0.000000e+00 : f32
    %6 = vector.broadcast %cst_5 : f32 to vector<8x32xf32>
    %7 = arith.maximumf %5, %6 : vector<8x32xf32>
    %c0_6 = arith.constant 0 : index
    %c0_7 = arith.constant 0 : index
    %8 = vector.load %arg4[%c0_6, %c0_7] : memref<32x32xf32, #tpu.memory_space<vmem>>, vector<32x32xf32>
    %cst_8 = arith.constant dense<0.000000e+00> : vector<8x32xf32>
    %9 = tpu.matmul %7, %8, %cst_8 {dimension_numbers = #tpu.dot_dimension_numbers<[1], [0], [0], [1], [0, 0, 1, 1], [], []>} : vector<8x32xf32>, vector<32x32xf32>, vector<8x32xf32> -> vector<8x32xf32>
    %c0_9 = arith.constant 0 : index
    %c0_10 = arith.constant 0 : index
    %10 = vector.load %arg5[%c0_9, %c0_10] : memref<1x32xf32, #tpu.memory_space<vmem>>, vector<1x32xf32>
    %11 = vector.broadcast %10 : vector<1x32xf32> to vector<8x32xf32>
    %12 = arith.addf %9, %11 : vector<8x32xf32>
    %cst_11 = arith.constant 0.000000e+00 : f32
    %13 = vector.broadcast %cst_11 : f32 to vector<8x32xf32>
    %14 = arith.maximumf %12, %13 : vector<8x32xf32>
    %c0_12 = arith.constant 0 : index
    %c0_13 = arith.constant 0 : index
    %15 = vector.load %arg6[%c0_12, %c0_13] : memref<32x4xf32, #tpu.memory_space<vmem>>, vector<32x4xf32>
    %cst_14 = arith.constant dense<0.000000e+00> : vector<8x4xf32>
    %16 = tpu.matmul %14, %15, %cst_14 {dimension_numbers = #tpu.dot_dimension_numbers<[1], [0], [0], [1], [0, 0, 1, 1], [], []>} : vector<8x32xf32>, vector<32x4xf32>, vector<8x4xf32> -> vector<8x4xf32>
    %c0_15 = arith.constant 0 : index
    %c0_16 = arith.constant 0 : index
    %17 = vector.load %arg7[%c0_15, %c0_16] : memref<1x4xf32, #tpu.memory_space<vmem>>, vector<1x4xf32>
    %18 = vector.broadcast %17 : vector<1x4xf32> to vector<8x4xf32>
    %19 = arith.addf %16, %18 : vector<8x4xf32>
    %c0_17 = arith.constant 0 : index
    %c0_18 = arith.constant 0 : index
    %20 = vector.load %arg10[%c0_17, %c0_18] : memref<8x4xf32, #tpu.memory_space<vmem>>, vector<8x4xf32>
    tpu.vector_store %arg10[%c0_17, %c0_18], %19 {strides = array<i32>} : memref<8x4xf32, #tpu.memory_space<vmem>>, vector<8x4xf32>,
    %c0_19 = arith.constant 0 : index
    %c0_20 = arith.constant 0 : index
    %21 = vector.load %arg8[%c0_19, %c0_20] : memref<32x1xf32, #tpu.memory_space<vmem>>, vector<32x1xf32>
    %cst_21 = arith.constant dense<0.000000e+00> : vector<8x1xf32>
    %22 = tpu.matmul %14, %21, %cst_21 {dimension_numbers = #tpu.dot_dimension_numbers<[1], [0], [0], [1], [0, 0, 1, 1], [], []>} : vector<8x32xf32>, vector<32x1xf32>, vector<8x1xf32> -> vector<8x1xf32>
    %c0_22 = arith.constant 0 : index
    %c0_23 = arith.constant 0 : index
    %23 = vector.load %arg9[%c0_22, %c0_23] : memref<1x1xf32, #tpu.memory_space<vmem>>, vector<1x1xf32>
    %24 = vector.broadcast %23 : vector<1x1xf32> to vector<8x1xf32>
    %25 = arith.addf %22, %24 : vector<8x1xf32>
    %c0_24 = arith.constant 0 : index
    %c0_25 = arith.constant 0 : index
    %26 = vector.load %arg11[%c0_24, %c0_25] : memref<8x1xf32, #tpu.memory_space<vmem>>, vector<8x1xf32>
    tpu.vector_store %arg11[%c0_24, %c0_25], %25 {strides = array<i32>} : memref<8x1xf32, #tpu.memory_space<vmem>>, vector<8x1xf32>,
    return
  }
  func.func @transform_0(%arg0: i32) -> (i32, i32) {
    %c0_i32 = arith.constant 0 : i32
    %c0_i32_0 = arith.constant 0 : i32
    return %arg0, %c0_i32 : i32, i32
  }
  func.func @transform_1(%arg0: i32) -> (i32, i32) {
    %c0_i32 = arith.constant 0 : i32
    %c0_i32_0 = arith.constant 0 : i32
    %c0_i32_1 = arith.constant 0 : i32
    return %c0_i32, %c0_i32_0 : i32, i32
  }
  func.func @transform_2(%arg0: i32) -> (i32, i32) {
    %c0_i32 = arith.constant 0 : i32
    %c0_i32_0 = arith.constant 0 : i32
    %c0_i32_1 = arith.constant 0 : i32
    return %c0_i32, %c0_i32_0 : i32, i32
  }
  func.func @transform_3(%arg0: i32) -> (i32, i32) {
    %c0_i32 = arith.constant 0 : i32
    %c0_i32_0 = arith.constant 0 : i32
    %c0_i32_1 = arith.constant 0 : i32
    return %c0_i32, %c0_i32_0 : i32, i32
  }
  func.func @transform_4(%arg0: i32) -> (i32, i32) {
    %c0_i32 = arith.constant 0 : i32
    %c0_i32_0 = arith.constant 0 : i32
    %c0_i32_1 = arith.constant 0 : i32
    return %c0_i32, %c0_i32_0 : i32, i32
  }
  func.func @transform_5(%arg0: i32) -> (i32, i32) {
    %c0_i32 = arith.constant 0 : i32
    %c0_i32_0 = arith.constant 0 : i32
    %c0_i32_1 = arith.constant 0 : i32
    return %c0_i32, %c0_i32_0 : i32, i32
  }
  func.func @transform_6(%arg0: i32) -> (i32, i32) {
    %c0_i32 = arith.constant 0 : i32
    %c0_i32_0 = arith.constant 0 : i32
    %c0_i32_1 = arith.constant 0 : i32
    return %c0_i32, %c0_i32_0 : i32, i32
  }
  func.func @transform_7(%arg0: i32) -> (i32, i32) {
    %c0_i32 = arith.constant 0 : i32
    %c0_i32_0 = arith.constant 0 : i32
    %c0_i32_1 = arith.constant 0 : i32
    return %c0_i32, %c0_i32_0 : i32, i32
  }
  func.func @transform_8(%arg0: i32) -> (i32, i32) {
    %c0_i32 = arith.constant 0 : i32
    %c0_i32_0 = arith.constant 0 : i32
    %c0_i32_1 = arith.constant 0 : i32
    return %c0_i32, %c0_i32_0 : i32, i32
  }
  func.func @transform_9(%arg0: i32) -> (i32, i32) {
    %c0_i32 = arith.constant 0 : i32
    %c0_i32_0 = arith.constant 0 : i32
    return %arg0, %c0_i32 : i32, i32
  }
  func.func @transform_10(%arg0: i32) -> (i32, i32) {
    %c0_i32 = arith.constant 0 : i32
    %c0_i32_0 = arith.constant 0 : i32
    return %arg0, %c0_i32 : i32, i32
  }
}

</mosaic_0001>

<bundles_post_ra>
// kernel: tpu_custom_call.1
= control target key start
LH: loop header
LB: loop body
LE: loop exit
PB: predicated region body
PF: predicated region fallthrough
CT: control target
= control target key end

     0   :  { %v452_v0 = vmov 0.0   ;;  %vm453_vm0 = vmmov 0   ;;  %vm46_vm1 = vcmask 130048   ;;  %vm132_vm2 = vcmask 261120   ;;  %s579_s1 = inlined_call_operand.vmem [shape: f32[16,32], index: 1, kind: input, shape index: {}]   ;;  %s580_s0 = inlined_call_operand.vmem [shape: f32[8,16], index: 0, kind: input, shape index: {}]   ;;  %s581_s3 = inlined_call_operand.vmem [shape: f32[32,32], index: 3, kind: input, shape index: {}]   ;;  %s582_s5 = inlined_call_operand.vmem [shape: f32[32,4], index: 5, kind: input, shape index: {}]   ;;  %s583_s2 = inlined_call_operand.vmem [shape: f32[1,32], index: 2, kind: input, shape index: {}]   ;;  %s584_s7 = inlined_call_operand.vmem [shape: f32[32,1], index: 7, kind: input, shape index: {}]   ;;  %s585_s4 = inlined_call_operand.vmem [shape: f32[1,32], index: 4, kind: input, shape index: {}]   ;;  %s586_s8 = inlined_call_operand.<no memory space> [shape: f32[1,1], index: 8, kind: input, shape index: {}]   ;;  %s587_s6 = inlined_call_operand.vmem [shape: f32[1,4], index: 6, kind: input, shape index: {}]   ;;  %s588_s9 = inlined_call_operand.vmem [shape: f32[8,4], index: 9, kind: output, shape index: {0}]   ;;  %s589_s10 = inlined_call_operand.vmem [shape: f32[8,1], index: 10, kind: output, shape index: {1}]  }
   0x1   :  { %410 = vmatprep.subr.mxu0 %v452_v0  ;;  %v38_v1 = vld [vmem:[%s579_s1 + $0x8] sm:$0xff]  ;;  %v37_v2 = vld [vmem:[%s579_s1] sm:$0xff]  ;;  %414 = vmatprep.mubr.msk.f32.mxu0 %vm453_vm0, %v452_v0  ;;  %v124_v4 = vld [vmem:[%s581_s3 + $0x18] sm:$0xff]  ;;  %v16_v26 = vstv %s586_s8  ;;  %vm291_vm3 = vcmask 31744   ;;  %vm374_vm4 = vcmask 7168  }
   0x2   :  { %411 = vmatpush3.msra.mxu0 %v38_v1  ;;  %v36_v3 = vld [vmem:[%s580_s0] sm:$0xff]  ;;  %417 = vmatprep.subr.mxu1 %v452_v0  ;;  %v123_v5 = vld [vmem:[%s581_s3 + $0x10] sm:$0xff]  ;;  %v122_v6 = vld [vmem:[%s581_s3 + $0x8] sm:$0xff]  ;;  %17 = vst [vmem:[#allocation2] sm:$0x1] %v16_v26 }
   0x3   :  { %412 = vmatprep.subr.mxu0 %v452_v0  ;;  %418 = vmatpush3.msra.mxu1 %v124_v4  ;;  %v121_v7 = vld [vmem:[%s581_s3] sm:$0xff]  ;;  %v210_v8 = vld [vmem:[%s582_s5 + $0x18] sm:$0xff]  ;;  %v209_v15 = vld [vmem:[%s582_s5 + $0x10] sm:$0xff] }
   0x4   :  { %413 = vmatpush3.msra.mxu0 %v37_v2  ;;  %419 = vmatprep.subr.mxu1 %v452_v0  ;;  %v384_v9 = vld [vmem:[%s583_s2] ss:$0 sm:$0xff]  ;;  %v296_v14 = vld [vmem:[%s584_s7 + $0x18] sm:$0xff]  ;;  %v295_v16 = vld [vmem:[%s584_s7 + $0x10] sm:$0xff] }
   0x5   :  { %415 = vmatmul.mubr.msk.f32.vlgmr.msra.gmra.mxu0 %vm46_vm1, %v36_v3  ;;  %425 = vmatprep.mubr.msk.f32.mxu1 %vm453_vm0, %v452_v0  ;;  %v208_v17 = vld [vmem:[%s582_s5 + $0x8] sm:$0xff]  ;;  %v207_v19 = vld [vmem:[%s582_s5] sm:$0xff] }
   0x6   :  { %428 = vmatprep.subr.mxu0 %v452_v0  ;;  %436 = vmatprep.mubr.msk.f32.mxu0 %vm453_vm0, %v452_v0  ;;  %v294_v18 = vld [vmem:[%s584_s7 + $0x8] sm:$0xff]  ;;  %v293_v20 = vld [vmem:[%s584_s7] sm:$0xff] }
   0x7   :  { %420 = vmatpush3.msra.mxu1 %v123_v5  ;;  %429 = vmatpush3.msra.mxu0 %v210_v8  ;;  %v386_v21 = vld [vmem:[%s585_s4] ss:$0 sm:$0xff] }
   0x8   :  { %421 = vmatprep.subr.mxu1 %v452_v0  ;;  %430 = vmatprep.subr.mxu0 %v452_v0  ;;  %v388_v27 = vld [vmem:[%s587_s6] ss:$0 sm:$0xff] }
   0x9   :  { %422 = vmatpush3.msra.mxu1 %v122_v6  ;;  %431 = vmatpush3.msra.mxu0 %v209_v15  ;;  %v390_v28 = vld [vmem:[#allocation2] ss:$0 sm:$0xff] }
   0xa   :  { %423 = vmatprep.subr.mxu1 %v452_v0  ;;  %432 = vmatprep.subr.mxu0 %v452_v0 }
   0xb   :  { %424 = vmatpush3.msra.mxu1 %v121_v7  ;;  %433 = vmatpush3.msra.mxu0 %v208_v17 }
   0xc   :  { %439 = vmatprep.subr.mxu1 %v452_v0  ;;  %434 = vmatprep.subr.mxu0 %v452_v0 }
   0xd   :  { %435 = vmatpush3.msra.mxu0 %v207_v19 }
  0xc5   :  { %v116_v10 = vpop.f32.mrf.mxu0 }
  0xc6   :  { %v117_v11 = vadd.f32 %v384_v9, %v116_v10 }
  0xc7   :  { %v416_v12 = vpop.f32.mrf.mxu0 }
  0xc8   :  { %v120_v13 = vmax.f32 %v117_v11, 0.0 }
  0xca   :  { %426 = vmatmul.mubr.msk.f32.vlgmr.msra.gmra.mxu1 %vm132_vm2, %v120_v13 }
  0xcb   :  { %440 = vmatpush3.msra.mxu1 %v296_v14  ;;  %447 = vmatprep.mubr.msk.f32.mxu1 %vm453_vm0, %v452_v0 }
  0xcc   :  { %441 = vmatprep.subr.mxu1 %v452_v0 }
  0xcd   :  { %442 = vmatpush3.msra.mxu1 %v295_v16 }
  0xce   :  { %443 = vmatprep.subr.mxu1 %v452_v0 }
  0xcf   :  { %444 = vmatpush3.msra.mxu1 %v294_v18 }
  0xd0   :  { %445 = vmatprep.subr.mxu1 %v452_v0 }
  0xd1   :  { %446 = vmatpush3.msra.mxu1 %v293_v20 }
 0x18a   :  { %v202_v22 = vpop.f32.mrf.mxu1 }
 0x18b   :  { %v203_v23 = vadd.f32 %v386_v21, %v202_v22 }
 0x18c   :  { %v427_v24 = vpop.f32.mrf.mxu1 }
 0x18d   :  { %v206_v25 = vmax.f32 %v203_v23, 0.0 }
 0x18f   :  { %437 = vmatmul.mubr.msk.f32.vlgmr.msra.gmra.mxu0 %vm132_vm2, %v206_v25  ;;  %448 = vmatmul.mubr.msk.f32.vlgmr.msra.gmra.mxu1 %vm132_vm2, %v206_v25 }
 0x24f   :  { %v287_v29 = vpop.f32.mrf.mxu0  ;;  %v370_v30 = vpop.f32.mrf.mxu1 }
 0x250   :  { %v288_v31 = vadd.f32 %v388_v27, %v287_v29  ;;  %v371_v32 = vadd.f32 %v390_v28, %v370_v30 }
 0x251   :  { %v438_v33 = vpop.f32.mrf.mxu0  ;;  %v449_v34 = vpop.f32.mrf.mxu1 }
 0x252   :  { %292 = vst.msk [vmem:[%s588_s9] sm:$0xff] %vm291_vm3, %v288_v31 }
 0x253   :  { %375 = vst.msk [vmem:[%s589_s10] sm:$0xff] %vm374_vm4, %v371_v32 }

</bundles_post_ra>
